<compile_context>
chip_gen: v7x
topology: tpu7x:2x2x1
jax: 0.10.0
libtpu: 0.0.40
codegen_flags: <defaults>
</compile_context>

<pallas_src>
import math

import jax
import jax.numpy as jnp
from jax import lax
from jax.experimental import pallas as pl
from jax.experimental.pallas import tpu as pltpu

_LANE = 128
_SUBLANE = 8
_MASK_VALUE = -1.0e30          # finite "-inf": exp() underflows to exactly 0.0


def _round_up(x, m):
    return ((x + m - 1) // m) * m


def _vmem_capacity_bytes():
    try:
        return int(pltpu.get_tpu_info().vmem_capacity_bytes)
    except Exception:
        return 64 * 1024 * 1024          # conservative (v7x per-TensorCore VMEM)


def _vmem_limit_bytes(cap):
    # leave headroom under physical; ~100 MiB on v5e/v6e, ~54 MiB on v7x
    return int(min(0.85 * cap, 100 * 1024 * 1024))


def _choose_q_tile(Lq, kv_len, Ep, itemsize, has_side, return_att, vmem_cap,
                   q_tile=None):
    """Largest Lq tile that fits a conservative VMEM budget.

    If the tile does not divide Lq the wrapper zero-pads Lq up to a multiple
    (padded query rows are sliced off afterwards), so awkward sequence lengths
    never silently fall back to a whole-Lq block.
    """
    if q_tile is not None:
        assert q_tile == Lq or q_tile % _SUBLANE == 0, "q_tile must be 8-aligned"
        return int(q_tile)
    if Lq <= 256:
        return Lq                                    # full-extent block is legal
    budget = max(int(0.35 * vmem_cap) - 4 * kv_len * Ep * itemsize, 1 << 20)
    for tq in (256, 128, 64, 32, 16, 8):
        per_q = (4 * tq * Ep * itemsize                        # q + y, dbl-buffered
                 + (2 * tq * kv_len * itemsize if has_side else 0)
                 + (2 * tq * kv_len * itemsize if return_att else 0)
                 + 3 * tq * kv_len * 4                         # f32 score/prob temps
                 + tq * Ep * 4)                                # f32 accumulator
        if per_q <= budget:
            return tq
    return _SUBLANE


def _make_full_kernel(scale, has_side, return_att):
    """One whole-Lk block per grid step; optionally writes the attention matrix."""

    def kernel(q_ref, k_ref, v_ref, *refs):
        idx = 0
        side_ref = None
        if has_side:
            side_ref = refs[idx]
            idx += 1
        y_ref = refs[idx]
        idx += 1
        att_ref = refs[idx] if return_att else None

        q = q_ref[0] * scale                 # (TQ, Ep), scale folded into q (TQ*E muls)
        k = k_ref[0]                         # (Lk, Ep)  native dtype
        v = v_ref[0]                         # (Lk, Ep)  native dtype

        # q @ k^T contracting the head dims directly (MXU-native NT form).
        s = lax.dot_general(q, k, (((1,), (1,)), ((), ())),
                            preferred_element_type=jnp.float32)        # (TQ, Lk) f32
        if has_side:
            s = s + side_ref[0].astype(jnp.float32)

        m = jnp.max(s, axis=-1, keepdims=True)
        p = jnp.exp(s - m)
        l = jnp.sum(p, axis=-1, keepdims=True)

        if return_att:
            att = p / l
            y = jnp.dot(att.astype(v.dtype), v,
                        preferred_element_type=jnp.float32)
            att_ref[0] = att.astype(att_ref.dtype)
        else:
            # deferred normalization: scale the (TQ, Ep) result, not (TQ, Lk).
            y = jnp.dot(p.astype(v.dtype), v,
                        preferred_element_type=jnp.float32) / l
        y_ref[0] = y.astype(y_ref.dtype)

    return kernel


def _make_flash_kernel(scale, has_side):
    """Online-softmax kernel: grid = (B, n_q, n_k); Lk axis is 'arbitrary'."""

    def kernel(q_ref, k_ref, v_ref, *refs):
        idx = 0
        side_ref = None
        if has_side:
            side_ref = refs[idx]
            idx += 1
        y_ref = refs[idx]
        m_sc, l_sc, acc_sc = refs[idx + 1], refs[idx + 2], refs[idx + 3]

        j = pl.program_id(2)

        @pl.when(j == 0)
        def _init():
            m_sc[...] = jnp.full(m_sc.shape, -jnp.inf, m_sc.dtype)
            l_sc[...] = jnp.zeros(l_sc.shape, l_sc.dtype)
            acc_sc[...] = jnp.zeros(acc_sc.shape, acc_sc.dtype)

        q = q_ref[0] * scale                  # (TQ, Ep) native dtype
        k = k_ref[0]                          # (TK, Ep)
        v = v_ref[0]                          # (TK, Ep)

        s = lax.dot_general(q, k, (((1,), (1,)), ((), ())),
                            preferred_element_type=jnp.float32)        # (TQ, TK) f32
        if has_side:
            s = s + side_ref[0].astype(jnp.float32)

        m_prev = m_sc[...]
        m_new = jnp.maximum(m_prev, jnp.max(s, axis=-1, keepdims=True))
        alpha = jnp.exp(m_prev - m_new)
        p = jnp.exp(s - m_new)

        l_sc[...] = alpha * l_sc[...] + jnp.sum(p, axis=-1, keepdims=True)
        acc_sc[...] = alpha * acc_sc[...] + jnp.dot(
            p.astype(v.dtype), v, preferred_element_type=jnp.float32)
        m_sc[...] = m_new

        @pl.when(j == pl.num_programs(2) - 1)
        def _finalize():
            y_ref[0] = (acc_sc[...] / l_sc[...]).astype(y_ref.dtype)

    return kernel


def scaled_dot_product(q, k, v, att_mask=None, position_bias=None,
                       return_attn_matrix=False, *, q_tile=None, k_tile=None):
    """JAX/Pallas equivalent of ScaledDotProduct.forward (dropout prob == 0)."""
    q = jnp.asarray(q)
    k = jnp.asarray(k)
    v = jnp.asarray(v)
    B, Lq, E = q.shape
    Lk = k.shape[1]
    out_dtype = q.dtype
    scale = 1.0 / math.sqrt(E)               # PyTorch: q / sqrt(k.size(-1))

    has_mask = att_mask is not None
    has_bias = position_bias is not None
    has_side = has_mask or has_bias

    # ---- per-batch "mask entirely empty" flags (wrapper-side out_mask) -------
    empty = None
    am = None
    if has_mask:
        am = jnp.asarray(att_mask).astype(bool)
        if am.ndim == 2:
            am = am[None]
        empty = jnp.sum(am, axis=(-2, -1)) == 0            # (1,) or (B,)

    # ---- fuse mask + bias into ONE additive tensor in the compute dtype ------
    side = None
    if has_side:
        if has_bias:
            pb = jnp.asarray(position_bias).astype(jnp.float32)
            while pb.ndim < 3:
                pb = pb[None]
        else:
            pb = jnp.zeros((1, 1, 1), jnp.float32)
        if has_mask:
            side = jnp.where(am, pb, jnp.float32(_MASK_VALUE))
        else:
            side = pb
        sb = side.shape[0]
        assert sb in (1, B), "mask/bias batch dim must be 1 or B"
        side = jnp.broadcast_to(side, (sb, Lq, Lk)).astype(out_dtype)

    # ---- layout: lane-dense head dim, VMEM-budget-aware Lq tiling ------------
    Ep = E if E % _LANE == 0 else _round_up(E, _LANE)
    cap = _vmem_capacity_bytes()
    itemsize = jnp.dtype(out_dtype).itemsize

    TK = None
    if not return_attn_matrix:
        if k_tile is not None and k_tile % _LANE == 0 and Lk % k_tile == 0:
            TK = int(k_tile)
        else:
            for cand in (512, 384, 256, 128):
                if Lk >= 2 * cand and Lk % cand == 0:
                    TK = cand
                    break
    use_flash = TK is not None

    kv_width = TK if use_flash else Lk
    TQ = _choose_q_tile(Lq, kv_width, Ep, itemsize, has_side,
                        return_attn_matrix, cap, q_tile)
    Lqp = Lq if TQ == Lq else _round_up(Lq, TQ)
    n_q = Lqp // TQ

    qp, kp, vp = q, k, v
    if Ep != E or Lqp != Lq:
        qp = jnp.pad(q, ((0, 0), (0, Lqp - Lq), (0, Ep - E)))
    if Ep != E:
        kp = jnp.pad(k, ((0, 0), (0, 0), (0, Ep - E)))
        vp = jnp.pad(v, ((0, 0), (0, 0), (0, Ep - E)))
    if side is not None and Lqp != Lq:
        side = jnp.pad(side, ((0, 0), (0, Lqp - Lq), (0, 0)))

    inputs = [qp, kp, vp]
    scratch = []

    if use_flash:
        n_k = Lk // TK
        grid = (B, n_q, n_k)
        in_specs = [
            pl.BlockSpec((1, TQ, Ep), lambda b, i, j: (b, i, 0)),   # q (resident over j)
            pl.BlockSpec((1, TK, Ep), lambda b, i, j: (b, j, 0)),   # k tile
            pl.BlockSpec((1, TK, Ep), lambda b, i, j: (b, j, 0)),   # v tile
        ]
        if has_side:
            if side.shape[0] == 1:
                smap = lambda b, i, j: (0, i, j)    # one block shared by all batches
            else:
                smap = lambda b, i, j: (b, i, j)
            in_specs.append(pl.BlockSpec((1, TQ, TK), smap))
            inputs.append(side)
        out_specs = (pl.BlockSpec((1, TQ, Ep), lambda b, i, j: (b, i, 0)),)
        out_shapes = (jax.ShapeDtypeStruct((B, Lqp, Ep), out_dtype),)
        kernel = _make_flash_kernel(scale, has_side)
        scratch = [pltpu.VMEM((TQ, 1), jnp.float32),      # running max
                   pltpu.VMEM((TQ, 1), jnp.float32),      # running denom
                   pltpu.VMEM((TQ, Ep), jnp.float32)]     # running output acc
        dims = ("parallel", "parallel", "arbitrary")
    else:
        grid = (B, n_q)
        in_specs = [
            pl.BlockSpec((1, TQ, Ep), lambda b, i: (b, i, 0)),      # q tile
            pl.BlockSpec((1, Lk, Ep), lambda b, i: (b, 0, 0)),      # k (resident over i)
            pl.BlockSpec((1, Lk, Ep), lambda b, i: (b, 0, 0)),      # v (resident over i)
        ]
        if has_side:
            if side.shape[0] == 1:
                smap = lambda b, i: (0, i, 0)
            else:
                smap = lambda b, i: (b, i, 0)
            in_specs.append(pl.BlockSpec((1, TQ, Lk), smap))
            inputs.append(side)
        out_specs = [pl.BlockSpec((1, TQ, Ep), lambda b, i: (b, i, 0))]
        out_shapes = [jax.ShapeDtypeStruct((B, Lqp, Ep), out_dtype)]
        if return_attn_matrix:
            out_specs.append(pl.BlockSpec((1, TQ, Lk), lambda b, i: (b, i, 0)))
            out_shapes.append(jax.ShapeDtypeStruct((B, Lqp, Lk), out_dtype))
        out_specs = tuple(out_specs)
        out_shapes = tuple(out_shapes)
        kernel = _make_full_kernel(scale, has_side, return_attn_matrix)
        dims = ("parallel", "parallel")

    flops = int(4 * B * Lqp * Lk * Ep)
    transcendentals = int(B * Lqp * Lk)
    bytes_accessed = int(sum(x.size * x.dtype.itemsize for x in inputs)
                         + sum(math.prod(s.shape) * jnp.dtype(s.dtype).itemsize
                               for s in out_shapes))

    outs = pl.pallas_call(
        kernel,
        out_shape=out_shapes,
        grid=grid,
        in_specs=in_specs,
        out_specs=out_specs,
        scratch_shapes=scratch,
        compiler_params=pltpu.CompilerParams(
            dimension_semantics=dims,
            vmem_limit_bytes=_vmem_limit_bytes(cap)),
        cost_estimate=pl.CostEstimate(flops=flops,
                                      transcendentals=transcendentals,
                                      bytes_accessed=bytes_accessed),
    )(*inputs)

    y = outs[0][:, :Lq, :E]
    if has_mask:
        # PyTorch out_mask: zero the rows of batches whose mask is entirely empty.
        eb = jnp.broadcast_to(empty, (B,))
        y = jnp.where(eb[:, None, None], jnp.asarray(0, y.dtype), y)

    if return_attn_matrix:
        att = outs[1][:, :Lq, :]
        return y, att
    return y, None


def _reference(q, k, v, att_mask=None, position_bias=None):
    """Pure-JAX mirror of the PyTorch module (dropout == 0)."""
    B, Lq, E = q.shape
    Lk = k.shape[1]
    att = jnp.einsum("bqe,bke->bqk",
                     q.astype(jnp.float32) / math.sqrt(E),
                     k.astype(jnp.float32),
                     precision=lax.Precision.HIGHEST)
    if att_mask is not None:
        m = jnp.asarray(att_mask).astype(bool)
        if m.ndim == 2:
            m = m[None]
        m = jnp.broadcast_to(m, (B, Lq, Lk))
        att = jnp.where(m, att, -jnp.inf)
        empty = jnp.sum(m, axis=(-2, -1)) == 0
    else:
        empty = jnp.zeros((B,), bool)
    if position_bias is not None:
        pb = jnp.asarray(position_bias).astype(jnp.float32)
        while pb.ndim < 3:
            pb = pb[None]
        att = att + pb
    att = jnp.where(empty[:, None, None], 1e-5, att)
    att = jax.nn.softmax(att, axis=-1)
    y = jnp.einsum("bqk,bke->bqe", att, v.astype(jnp.float32),
                   precision=lax.Precision.HIGHEST)
    y = jnp.where(empty[:, None, None], 0.0, y)
    return y.astype(q.dtype), att.astype(q.dtype)


if __name__ == "__main__":
    root = jax.random.PRNGKey(0)
    r1, r2, r3, r4, r5, r6, r7, r8 = jax.random.split(root, 8)
    # Tolerance allows bf16-class MXU error on real HW; semantic errors
    # (wrong masking / normalization) are O(0.1 - 1) and still caught.
    ATOL = RTOL = 2e-2

    def check(name, got, want):
        assert got.shape == want.shape, f"{name}: shape {got.shape} vs {want.shape}"
        assert bool(jnp.all(jnp.isfinite(got))), f"{name}: non-finite values"
        assert bool(jnp.allclose(got, want, atol=ATOL, rtol=RTOL)), f"{name}: mismatch"

    # ---- case 1: full kernel, mask + bias, attention matrix returned --------
    B, Lq, Lk, E = 2, 16, 16, 32
    q = jax.random.normal(r1, (B, Lq, E), jnp.float32)
    k = jax.random.normal(r2, (B, Lk, E), jnp.float32)
    v = jax.random.normal(r3, (B, Lk, E), jnp.float32)
    causal = jnp.tril(jnp.ones((Lq, Lk), bool))
    att_mask = jnp.stack([causal, jnp.zeros((Lq, Lk), bool)])   # batch 1: empty mask
    bias = 0.1 * jax.random.normal(r4, (B, Lq, Lk), jnp.float32)

    y, att = scaled_dot_product(q, k, v, att_mask, bias, return_attn_matrix=True)
    jax.block_until_ready(y)
    y_ref, att_ref = _reference(q, k, v, att_mask, bias)
    check("y (full, masked)", y, y_ref)
    check("att (full, masked)", att, att_ref)

    # ---- case 2: full kernel, no mask / bias / attention matrix -------------
    y2, att2 = scaled_dot_product(q, k, v)
    jax.block_until_ready(y2)
    assert att2 is None
    y2_ref, _ = _reference(q, k, v)
    check("y (full, no mask)", y2, y2_ref)

    # ---- case 3: flash kernel (Lk tiled by 128), no side input --------------
    B3, Lq3, Lk3, E3 = 2, 16, 256, 32
    q3 = jax.random.normal(r5, (B3, Lq3, E3), jnp.float32)
    k3 = jax.random.normal(r6, (B3, Lk3, E3), jnp.float32)
    v3 = jax.random.normal(r7, (B3, Lk3, E3), jnp.float32)
    y3, _ = scaled_dot_product(q3, k3, v3)
    jax.block_until_ready(y3)
    y3_ref, _ = _reference(q3, k3, v3)
    check("y (flash, no mask)", y3, y3_ref)

    # ---- case 4: flash kernel with mask + bias + an all-empty batch ---------
    rows = jnp.arange(Lq3)[:, None]
    cols = jnp.arange(Lk3)[None, :]
    mask0 = cols < 16 * (rows + 1)                     # every row keeps >= 16 keys
    att_mask3 = jnp.stack([mask0, jnp.zeros((Lq3, Lk3), bool)])
    bias3 = 0.1 * jax.random.normal(r8, (B3, Lq3, Lk3), jnp.float32)
    y4, _ = scaled_dot_product(q3, k3, v3, att_mask3, bias3)
    jax.block_until_ready(y4)
    y4_ref, _ = _reference(q3, k3, v3, att_mask3, bias3)
    check("y (flash, masked)", y4, y4_ref)

    print("KERNEL_OK")
</pallas_src>

<mosaic_0001>
module attributes {stable_mosaic.version = 11 : i64} {
  func.func @kernel(%arg0: i32, %arg1: i32, %arg2: memref<1x16x128xf32, #tpu.memory_space<vmem>>, %arg3: memref<1x16x128xf32, #tpu.memory_space<vmem>>, %arg4: memref<1x16x128xf32, #tpu.memory_space<vmem>>, %arg5: memref<1x16x16xf32, #tpu.memory_space<vmem>>, %arg6: memref<1x16x128xf32, #tpu.memory_space<vmem>>, %arg7: memref<1x16x16xf32, #tpu.memory_space<vmem>>) attributes {dimension_semantics = [#tpu.dimension_semantics<parallel>, #tpu.dimension_semantics<parallel>], iteration_bounds = array<i64: 2, 1>, scalar_prefetch = 0 : i64, scratch_operands = 0 : i64, tpu.core_type = #tpu.core_type<tc>, window_params = [{transform_indices = @transform_0, window_bounds = array<i64: 1, 16, 128>}, {transform_indices = @transform_1, window_bounds = array<i64: 1, 16, 128>}, {transform_indices = @transform_2, window_bounds = array<i64: 1, 16, 128>}, {transform_indices = @transform_3, window_bounds = array<i64: 1, 16, 16>}, {transform_indices = @transform_4, window_bounds = array<i64: 1, 16, 128>}, {transform_indices = @transform_5, window_bounds = array<i64: 1, 16, 16>}]} {
    %c0 = arith.constant 0 : index
    %c0_0 = arith.constant 0 : index
    %c0_1 = arith.constant 0 : index
    %0 = vector.load %arg2[%c0, %c0_0, %c0_1] : memref<1x16x128xf32, #tpu.memory_space<vmem>>, vector<1x16x128xf32>
    %1 = vector.shape_cast %0 : vector<1x16x128xf32> to vector<16x128xf32>
    %cst = arith.constant 0.176776692 : f32
    %2 = vector.broadcast %cst : f32 to vector<16x128xf32>
    %3 = arith.mulf %1, %2 : vector<16x128xf32>
    %c0_2 = arith.constant 0 : index
    %c0_3 = arith.constant 0 : index
    %c0_4 = arith.constant 0 : index
    %4 = vector.load %arg3[%c0_2, %c0_3, %c0_4] : memref<1x16x128xf32, #tpu.memory_space<vmem>>, vector<1x16x128xf32>
    %5 = vector.shape_cast %4 : vector<1x16x128xf32> to vector<16x128xf32>
    %c0_5 = arith.constant 0 : index
    %c0_6 = arith.constant 0 : index
    %c0_7 = arith.constant 0 : index
    %6 = vector.load %arg4[%c0_5, %c0_6, %c0_7] : memref<1x16x128xf32, #tpu.memory_space<vmem>>, vector<1x16x128xf32>
    %7 = vector.shape_cast %6 : vector<1x16x128xf32> to vector<16x128xf32>
    %cst_8 = arith.constant dense<0.000000e+00> : vector<16x16xf32>
    %8 = tpu.matmul %3, %5, %cst_8 {dimension_numbers = #tpu.dot_dimension_numbers<[1], [1], [0], [0], [0, 0, 1, 0], [], []>} : vector<16x128xf32>, vector<16x128xf32>, vector<16x16xf32> -> vector<16x16xf32>
    %c0_9 = arith.constant 0 : index
    %c0_10 = arith.constant 0 : index
    %c0_11 = arith.constant 0 : index
    %9 = vector.load %arg5[%c0_9, %c0_10, %c0_11] : memref<1x16x16xf32, #tpu.memory_space<vmem>>, vector<1x16x16xf32>
    %10 = vector.shape_cast %9 : vector<1x16x16xf32> to vector<16x16xf32>
    %11 = arith.addf %8, %10 : vector<16x16xf32>
    %cst_12 = arith.constant dense<0xFF800000> : vector<16xf32>
    %12 = vector.multi_reduction <maximumf>, %11, %cst_12 [1] : vector<16x16xf32> to vector<16xf32>
    %13 = vector.shape_cast %12 : vector<16xf32> to vector<16x1xf32>
    %14 = vector.broadcast %13 : vector<16x1xf32> to vector<16x16xf32>
    %15 = arith.subf %11, %14 : vector<16x16xf32>
    %16 = math.exp %15 : vector<16x16xf32>
    %cst_13 = arith.constant dense<0.000000e+00> : vector<16xf32>
    %17 = vector.multi_reduction <add>, %16, %cst_13 [1] : vector<16x16xf32> to vector<16xf32>
    %18 = vector.shape_cast %17 : vector<16xf32> to vector<16x1xf32>
    %19 = vector.broadcast %18 : vector<16x1xf32> to vector<16x16xf32>
    %20 = arith.divf %16, %19 : vector<16x16xf32>
    %cst_14 = arith.constant dense<0.000000e+00> : vector<16x128xf32>
    %21 = tpu.matmul %20, %7, %cst_14 {dimension_numbers = #tpu.dot_dimension_numbers<[1], [0], [0], [1], [0, 0, 1, 1], [], []>} : vector<16x16xf32>, vector<16x128xf32>, vector<16x128xf32> -> vector<16x128xf32>
    %c0_15 = arith.constant 0 : index
    %c0_16 = arith.constant 0 : index
    %c0_17 = arith.constant 0 : index
    %22 = vector.load %arg7[%c0_15, %c0_16, %c0_17] : memref<1x16x16xf32, #tpu.memory_space<vmem>>, vector<1x16x16xf32>
    %23 = vector.shape_cast %22 : vector<1x16x16xf32> to vector<16x16xf32>
    %24 = vector.shape_cast %20 : vector<16x16xf32> to vector<1x16x16xf32>
    tpu.vector_store %arg7[%c0_15, %c0_16, %c0_17], %24 {strides = array<i32>} : memref<1x16x16xf32, #tpu.memory_space<vmem>>, vector<1x16x16xf32>,
    %c0_18 = arith.constant 0 : index
    %c0_19 = arith.constant 0 : index
    %c0_20 = arith.constant 0 : index
    %25 = vector.load %arg6[%c0_18, %c0_19, %c0_20] : memref<1x16x128xf32, #tpu.memory_space<vmem>>, vector<1x16x128xf32>
    %26 = vector.shape_cast %25 : vector<1x16x128xf32> to vector<16x128xf32>
    %27 = vector.shape_cast %21 : vector<16x128xf32> to vector<1x16x128xf32>
    tpu.vector_store %arg6[%c0_18, %c0_19, %c0_20], %27 {strides = array<i32>} : memref<1x16x128xf32, #tpu.memory_space<vmem>>, vector<1x16x128xf32>,
    return
  }
  func.func @transform_0(%arg0: i32, %arg1: i32) -> (i32, i32, i32) {
    %c0_i32 = arith.constant 0 : i32
    %c0_i32_0 = arith.constant 0 : i32
    return %arg0, %arg1, %c0_i32 : i32, i32, i32
  }
  func.func @transform_1(%arg0: i32, %arg1: i32) -> (i32, i32, i32) {
    %c0_i32 = arith.constant 0 : i32
    %c0_i32_0 = arith.constant 0 : i32
    %c0_i32_1 = arith.constant 0 : i32
    return %arg0, %c0_i32, %c0_i32_0 : i32, i32, i32
  }
  func.func @transform_2(%arg0: i32, %arg1: i32) -> (i32, i32, i32) {
    %c0_i32 = arith.constant 0 : i32
    %c0_i32_0 = arith.constant 0 : i32
    %c0_i32_1 = arith.constant 0 : i32
    return %arg0, %c0_i32, %c0_i32_0 : i32, i32, i32
  }
  func.func @transform_3(%arg0: i32, %arg1: i32) -> (i32, i32, i32) {
    %c0_i32 = arith.constant 0 : i32
    %c0_i32_0 = arith.constant 0 : i32
    return %arg0, %arg1, %c0_i32 : i32, i32, i32
  }
  func.func @transform_4(%arg0: i32, %arg1: i32) -> (i32, i32, i32) {
    %c0_i32 = arith.constant 0 : i32
    %c0_i32_0 = arith.constant 0 : i32
    return %arg0, %arg1, %c0_i32 : i32, i32, i32
  }
  func.func @transform_5(%arg0: i32, %arg1: i32) -> (i32, i32, i32) {
    %c0_i32 = arith.constant 0 : i32
    %c0_i32_0 = arith.constant 0 : i32
    return %arg0, %arg1, %c0_i32 : i32, i32, i32
  }
}

</mosaic_0001>

<bundles_post_ra>
// kernel: tpu_custom_call.1
= control target key start
LH: loop header
LB: loop body
LE: loop exit
PB: predicated region body
PF: predicated region fallthrough
CT: control target
= control target key end

     0   :  { %s1648_s0 = inlined_call_operand.hbm [shape: f32[2,16,128], index: 0, kind: input, shape index: {}]   ;;  %s1649_s1 = inlined_call_operand.hbm [shape: f32[2,16,128], index: 1, kind: input, shape index: {}]   ;;  %s1650_s2 = inlined_call_operand.hbm [shape: f32[2,16,128], index: 2, kind: input, shape index: {}]   ;;  %s1651_s3 = inlined_call_operand.hbm [shape: f32[2,16,16], index: 3, kind: input, shape index: {}]   ;;  %s1652_s4 = inlined_call_operand.hbm [shape: f32[2,16,128], index: 4, kind: output, shape index: {0}]   ;;  %s1653_s5 = inlined_call_operand.hbm [shape: f32[2,16,16], index: 5, kind: output, shape index: {1}]  }
   0x1   :  { %1666 = sst [smem:[#allocation24_spill]] %s1648_s0 }
   0x2   :  { %1667 = sst [smem:[#allocation25_spill]] %s1649_s1 }
   0x3   :  { %11 = vsyncpa [#allocation3], 0 }
   0x4   :  { %13 = vsyncpa [#allocation3 + $0x1], 0 }
   0x5   :  { %14 = vsyncpa [#allocation6], 0 }
   0x6   :  { %16 = vsyncpa [#allocation6 + $0x1], 0 }
   0x7   :  { %17 = vsyncpa [#allocation9], 0 }
   0x8   :  { %19 = vsyncpa [#allocation9 + $0x1], 0 }
   0x9   :  { %20 = vsyncpa [#allocation4], 0 }
   0xa   :  { %22 = vsyncpa [#allocation4 + $0x1], 0 }
   0xb   :  { %23 = vsyncpa [#allocation12], 0 }
   0xc   :  { %25 = vsyncpa [#allocation12 + $0x1], 0  ;;  %s1269_s18 = smov 0   ;;  %s1271_s19 = smov 0  }
   0xd   :  { %s1273_s20 = smov 0   ;;  %s1275_s21 = smov 0  }
   0xe   :  { %s1277_s22 = smov 0   ;;  %s1279_s23 = smov 0  }
   0xf LB: > { %1668 = sst [smem:[#allocation18_spill]] %s1215_s20  ;;  %s1300_s24 = sadd.s32 4294967295, %s1227_s23   ;;  %s1227_s23 = sphi %s1279_s23, %s31_s23   ;;  %s1223_s22 = sphi %s1277_s22, %s1697_s22   ;;  %s1219_s21 = sphi %s1275_s21, %s1696_s21   ;;  %s1215_s20 = sphi %s1273_s20, %s1695_s20   ;;  %s1211_s19 = sphi %s1271_s19, %s1699_s19   ;;  %s1207_s18 = sphi %s1269_s18, %s1698_s18  }
  0x10   : > { %1669 = sst [smem:[#allocation19_spill]] %s1223_s22  ;;  %s823_s25 = sadd.s32 4294967294, %s1227_s23  }
  0x11   : > { %1670 = sst [smem:[#allocation20_spill]] %s1227_s23  ;;  %s43_s26 = sadd.s32 1, %s1223_s22 }
  0x12   : > { %s52_s27 = sadd.s32 1, %s1215_s20  ;;  %p45_p0 = scmp.ge.s32.totalorder %s43_s26, 2 }
  0x13   : > { %p59_p1 = scmp.ne.s32.totalorder %s1215_s20, %s1211_s19  ;;  %p60_p2 = scmp.eq.s32.totalorder %s1227_s23, 0 }
  0x14   : > { %p65_p3 = scmp.ne.s32.totalorder %s1211_s19, %s1207_s18  ;;  %s1701_s26 = smov (%p45_p0, %s43_s26), 0 }
  0x15   : > { %1671 = sst [smem:[#allocation21_spill]] %s1701_s26  ;;  %p1312_p4 = por %p60_p2, %p59_p1 }
  0x16   : > { %p66_p5 = scmp.eq.s32.totalorder %s1300_s24, 0  ;;  %s47_s29 = ssub.s32 %s1223_s22, %s1701_s26 }
  0x17   : > { %p171_p6 = scmp.eq.s32.totalorder %s1300_s24, 1  ;;  %p50_p7 = scmp.eq.s32.totalorder %s47_s29, 0 }
  0x18   : > { %p1320_p8 = por %p66_p5, %p65_p3  ;;  %p177_p10 = scmp.eq.s32.totalorder %s823_s25, 1 }
  0x19   : > { %p1324_p9 = por %p171_p6, %p59_p1  ;;  %p923_p13 = scmp.lt.s32.totalorder %s1227_s23, 2 }
  0x1a   : > { %s1673_s30 = scalar_select %p1320_p8, 1, 0 }
  0x1b   : > { %s1674_s6 = scalar_select %p1324_p9, 1, 0 }
  0x1c   : > { %s1329_s7 = scalar_select %p50_p7, %s1215_s20, %s52_s27  }
  0x1d   : > { %p1331_p11 = por %p177_p10, %p65_p3  ;;  %s1338_s9 = sand.u32 1, %s1215_s20  }
  0x1e   : > { %1675 = sst [smem:[#allocation22_spill]] %s1329_s7  ;;  %s1341_s10 = sshll.u32 %s1338_s9, 4 }
  0x1f   : > { %s1676_s8 = scalar_select %p1331_p11, 1, 0 }
  0x20   : > { %s1344_s11 = sshll.u32 %s1223_s22, 8  ;;  %p1348_p0 = pnand %p923_p13, %p1312_p4 }
  0x21   : > { %1677 = sst [smem:[#allocation23_spill]] %s1676_s8  ;;  %s248_s13 = sand.u32 1, %s1227_s23  }
  0x22   : > { %s1679_s1 = sld [smem:[#allocation25_spill]]  ;;  %s252_s17 = scalar_lea.vmem [#allocation5], %s1341_s10 }
  0x23   : > { %s259_s25 = sshll.u32 %s252_s17, 4  ;;  %s1364_s27 = scalar_lea.sflag [#allocation6], %s248_s13  ;;  %s1361_s25 = int_to_ptr.vmem [resolvable:$true] %s259_s25 }
  0x24   : > { %p1370_p4 = pneg %p1348_p0 }
  0x28   : > { %s1357_s16 = scalar_lea.hbm %s1679_s1, %s1344_s11  ;;  %s990_s17 = scalar_lea.hbm %s1679_s1, 512 }
  0x29   : > { %s985_s28 = scalar_lea.hbm %s1357_s16, 256  ;;  %p991_p7 = scmp.lt.u32.totalorder %s1357_s16, %s1679_s1 }
  0x2a   : > { %p986_p3 = scmp.ne.s32.totalorder %s1357_s16, %s985_s28  ;;  %p992_p10 = scmp.lt.u32.totalorder %s990_s17, %s985_s28 }
  0x2b   : > { %p994_p12 = scmp.lt.u32.totalorder %s985_s28, %s1357_s16 }
  0x2c   : > { %p988_p5 = pnand %p1370_p4, %p986_p3  ;;  %p993_p13 = por %p992_p10, %p991_p7 }
  0x2e   : > { %p989_p6 = pneg %p988_p5  ;;  %p995_p1 = por %p994_p12, %p993_p13 }
  0x30   : > { %p996_p2 = pnand %p995_p1, %p989_p6 }
  0x32   : > { %999 = shalt.err (!%p996_p2)
}
  0x33   : > { %s1000_s13 = scalar_lea.vmem %s1361_s25, 256  ;;  %s1229_s14 = smov [#allocation5]  }
  0x34   : > { %p1001_p3 = scmp.ne.s32.totalorder %s1361_s25, %s1000_s13  ;;  %s1005_s15 = sshll.u32 %s1229_s14, 4  ;;  %s1006_s15 = int_to_ptr.vmem [resolvable:$false] %s1005_s15 }
  0x35   : > { %s1007_s22 = scalar_lea.vmem %s1006_s15, 512  ;;  %p1008_p9 = scmp.lt.s32.totalorder %s1361_s25, %s1006_s15 }
  0x36   : > { %p1003_p5 = pnand %p1001_p3, %p1370_p4  ;;  %p1009_p8 = scmp.lt.s32.totalorder %s1007_s22, %s1000_s13 }
  0x38   : > { %p1004_p11 = pneg %p1003_p5  ;;  %p1010_p7 = por %p1009_p8, %p1008_p9 }
  0x3a   : > { %p1011_p10 = pnand %p1010_p7, %p1004_p11 }
  0x3c   : > { %1014 = shalt.err (!%p1011_p10)
}
  0x3d   : > { %s1658_s26 = smov 128   ;;  %s1660_s28 = smov 8  }
  0x3e   : > { %909 = dma.hbm_to_vmem [thread:$0]  (!%p1348_p0), %s1357_s16, 256, %s1361_s25, %s1364_s27, %s1658_s26, %s1658_s26, %s1660_s28  }
  0x3f   : > { %p1681_p8 = scmp.lt.s32.totalorder %s1227_s23, 3  ;;  %p1682_p9 = scmp.ge.s32.totalorder %s1227_s23, 1 }
  0x40   : > { %s1684_s0 = sld [smem:[#allocation24_spill]]  ;;  %s229_s22 = scalar_lea.vmem [#allocation2], %s1341_s10 }
  0x41   : > { %p1401_p11 = pnand %p1682_p9, %p1681_p8  ;;  %s238_s1 = sshll.u32 %s229_s22, 4  ;;  %s1412_s1 = int_to_ptr.vmem [resolvable:$true] %s238_s1 }
  0x42   : > { %s1418_s26 = scalar_lea.hbm %s1650_s2, %s1344_s11  ;;  %s226_s28 = scalar_lea.sflag [#allocation3], %s1338_s9 }
  0x43   : > { %s1683_s17 = scalar_select %p1401_p11, 1, 0 }
  0x46   : > { %s1409_s15 = scalar_lea.hbm %s1684_s0, %s1344_s11  ;;  %s1020_s20 = scalar_lea.hbm %s1684_s0, 512 }
  0x47   : > { %s1015_s7 = scalar_lea.hbm %s1409_s15, 256  ;;  %p1021_p6 = scmp.lt.u32.totalorder %s1409_s15, %s1684_s0 }
  0x48   : > { %p1016_p12 = scmp.ne.s32.totalorder %s1409_s15, %s1015_s7  ;;  %p1022_p13 = scmp.lt.u32.totalorder %s1020_s20, %s1015_s7 }
  0x49   : > { %p1024_p5 = scmp.lt.u32.totalorder %s1015_s7, %s1409_s15 }
  0x4a   : > { %p1018_p1 = pnand %p1016_p12, %p1370_p4  ;;  %p1023_p3 = por %p1022_p13, %p1021_p6 }
  0x4c   : > { %p1019_p2 = pneg %p1018_p1  ;;  %p1025_p7 = por %p1024_p5, %p1023_p3 }
  0x4e   : > { %p1026_p10 = pnand %p1025_p7, %p1019_p2 }
  0x50   : > { %1029 = shalt.err (!%p1026_p10)
}
  0x51   : > { %s1030_s22 = scalar_lea.vmem %s1412_s1, 256  ;;  %s1232_s16 = smov [#allocation2]  }
  0x52   : > { %p1031_p8 = scmp.ne.s32.totalorder %s1412_s1, %s1030_s22  ;;  %s1035_s25 = sshll.u32 %s1232_s16, 4  ;;  %s1036_s25 = int_to_ptr.vmem [resolvable:$false] %s1035_s25 }
  0x53   : > { %s1037_s23 = scalar_lea.vmem %s1036_s25, 512  ;;  %p1038_p1 = scmp.lt.s32.totalorder %s1412_s1, %s1036_s25 }
  0x54   : > { %p1033_p9 = pnand %p1031_p8, %p1370_p4  ;;  %p1039_p11 = scmp.lt.s32.totalorder %s1037_s23, %s1030_s22 }
  0x56   : > { %p1034_p12 = pneg %p1033_p9  ;;  %p1040_p6 = por %p1039_p11, %p1038_p1 }
  0x58   : > { %p1041_p13 = pnand %p1040_p6, %p1034_p12 }
  0x5a   : > { %1044 = shalt.err (!%p1041_p13)
}
  0x5b   : > { %s1685_s20 = smov 8   ;;  %s1686_s7 = smov 128  }
  0x5c   : > { %906 = dma.hbm_to_vmem [thread:$0]  (!%p1348_p0), %s1409_s15, 256, %s1412_s1, %s226_s28, %s1686_s7, %s1686_s7, %s1685_s20  }
  0x5d   : > { %s273_s8 = scalar_lea.vmem [#allocation7], %s1341_s10  ;;  %s1045_s14 = scalar_lea.hbm %s1418_s26, 256 }
  0x5e   : > { %s280_s13 = sshll.u32 %s273_s8, 4  ;;  %p1046_p11 = scmp.ne.s32.totalorder %s1418_s26, %s1045_s14  ;;  %s1448_s13 = int_to_ptr.vmem [resolvable:$true] %s280_s13 }
  0x5f   : > { %s1050_s25 = scalar_lea.hbm %s1650_s2, 512  ;;  %p1051_p5 = scmp.lt.u32.totalorder %s1418_s26, %s1650_s2 }
  0x60   : > { %p1048_p2 = pnand %p1046_p11, %p1370_p4  ;;  %p1052_p7 = scmp.lt.u32.totalorder %s1050_s25, %s1045_s14 }
  0x61   : > { %p1054_p8 = scmp.lt.u32.totalorder %s1045_s14, %s1418_s26 }
  0x62   : > { %p1049_p3 = pneg %p1048_p2  ;;  %p1053_p10 = por %p1052_p7, %p1051_p5 }
  0x64   : > { %p1055_p9 = por %p1054_p8, %p1053_p10 }
  0x66   : > { %p1056_p12 = pnand %p1055_p9, %p1049_p3 }
  0x68   : > { %1059 = shalt.err (!%p1056_p12)
}
  0x69   : > { %s1060_s1 = scalar_lea.vmem %s1448_s13, 256  ;;  %s1233_s28 = smov [#allocation7]  }
  0x6a   : > { %p1061_p1 = scmp.ne.s32.totalorder %s1448_s13, %s1060_s1  ;;  %s1065_s15 = sshll.u32 %s1233_s28, 4  ;;  %s1066_s15 = int_to_ptr.vmem [resolvable:$false] %s1065_s15 }
  0x6b   : > { %s1067_s0 = scalar_lea.vmem %s1066_s15, 512  ;;  %p1068_p11 = scmp.lt.s32.totalorder %s1448_s13, %s1066_s15 }
  0x6c   : > { %p1063_p6 = pnand %p1061_p1, %p1370_p4  ;;  %p1069_p2 = scmp.lt.s32.totalorder %s1067_s0, %s1060_s1 }
  0x6e   : > { %p1064_p13 = pneg %p1063_p6  ;;  %p1070_p5 = por %p1069_p2, %p1068_p11 }
  0x70   : > { %p1071_p7 = pnand %p1070_p5, %p1064_p13 }
  0x72   : > { %1074 = shalt.err (!%p1071_p7)
}
  0x73   : > { %912 = dma.hbm_to_vmem [thread:$0]  (!%p1348_p0), %s1418_s26, 256, %s1448_s13, %s1364_s27, %s1686_s7, %s1686_s7, %s1685_s20  }
  0x74   : > { %s1479_s22 = scalar_lea.hbm %s1651_s3, %s1344_s11  ;;  %s294_s16 = scalar_lea.vmem [#allocation8], %s1341_s10 }
  0x75   : > { %s303_s25 = sshll.u32 %s294_s16, 4  ;;  %s291_s23 = scalar_lea.sflag [#allocation9], %s1338_s9  ;;  %s1482_s25 = int_to_ptr.vmem [resolvable:$true] %s303_s25 }
  0x76   : > { %s1075_s1 = scalar_lea.hbm %s1479_s22, 256  ;;  %s1080_s13 = scalar_lea.hbm %s1651_s3, 512 }
  0x77   : > { %p1076_p3 = scmp.ne.s32.totalorder %s1479_s22, %s1075_s1  ;;  %p1081_p9 = scmp.lt.u32.totalorder %s1479_s22, %s1651_s3 }
  0x78   : > { %p1082_p12 = scmp.lt.u32.totalorder %s1080_s13, %s1075_s1  ;;  %p1084_p6 = scmp.lt.u32.totalorder %s1075_s1, %s1479_s22 }
  0x79   : > { %p1078_p10 = pnand %p1076_p3, %p1370_p4 }
  0x7a   : > { %p1083_p1 = por %p1082_p12, %p1081_p9 }
  0x7b   : > { %p1079_p8 = pneg %p1078_p10 }
  0x7c   : > { %p1085_p13 = por %p1084_p6, %p1083_p1 }
  0x7e   : > { %p1086_p11 = pnand %p1085_p13, %p1079_p8 }
  0x80   : > { %1089 = shalt.err (!%p1086_p11)
}
  0x81   : > { %s1090_s10 = scalar_lea.vmem %s1482_s25, 256  ;;  %s1234_s15 = smov [#allocation8]  }
  0x82   : > { %p1091_p2 = scmp.ne.s32.totalorder %s1482_s25, %s1090_s10  ;;  %s1095_s0 = sshll.u32 %s1234_s15, 4  ;;  %s1096_s0 = int_to_ptr.vmem [resolvable:$false] %s1095_s0 }
  0x83   : > { %s1097_s8 = scalar_lea.vmem %s1096_s0, 512  ;;  %p1098_p3 = scmp.lt.s32.totalorder %s1482_s25, %s1096_s0 }
  0x84   : > { %p1093_p5 = pnand %p1091_p2, %p1370_p4  ;;  %p1099_p10 = scmp.lt.s32.totalorder %s1097_s8, %s1090_s10 }
  0x86   : > { %p1094_p7 = pneg %p1093_p5  ;;  %p1100_p9 = por %p1099_p10, %p1098_p3 }
  0x88   : > { %p1101_p12 = pnand %p1100_p9, %p1094_p7 }
  0x8a   : > { %1104 = shalt.err (!%p1101_p12)
}
  0x8b   : > { %915 = dma.hbm_to_vmem [thread:$0]  (!%p1348_p0), %s1479_s22, 256, %s1482_s25, %s291_s23, %s1686_s7, %s1686_s7, %s1685_s20  }
  0x8c   : > { %p1687_p4 = scmp.ne.s32.totalorder %s1683_s17, 0 }
  0x8d   : > { %s1514_s29 = sand.u32 (!%p1687_p4), 1, %s1211_s19   ;;  %p1688_p8 = scmp.ne.s32.totalorder (!%p1687_p4), %s1673_s30, 0 }
  0x8e   : > { %315 = sbr.rel (%p1687_p4) target bundleno = 927 (0x39f), region = 36  ;;  %s1517_s14 = sshll.u32 (!%p1687_p4), %s1514_s29, 4 }
  0x8f   : > { %s318_s12 = scalar_lea.sflag (!%p1687_p4), [#allocation3], %s1514_s29  ;;  %s321_s16 = scalar_lea.vmem (!%p1687_p4), [#allocation2], %s1517_s14 }
  0x95   : > { %1186 = dma.done.wait (%p1688_p8), %s318_s12, 256  }
  0x96   : > { %1188 = vsyncadd (%p1688_p8), %s318_s12, 4294967040  ;;  %s326_s9 = sand.u32 1, %s1300_s24   ;;  %s330_s20 = scalar_lea.vmem [#allocation5], %s1517_s14 }
  0x97   : > { %s327_s17 = scalar_lea.sflag [#allocation6], %s326_s9 }
  0x98   : > { %1190 = dma.done.wait (%p1688_p8), %s327_s17, 512  }
  0x99   : > { %1192 = vsyncadd (%p1688_p8), %s327_s17, 4294966784  ;;  %s339_s7 = scalar_lea.vmem [#allocation7], %s1517_s14  ;;  %s345_s22 = scalar_lea.sflag [#allocation9], %s1514_s29 }
  0x9a   : > { %s348_s25 = scalar_lea.vmem [#allocation8], %s1517_s14 }
  0x9b   : > { %1194 = dma.done.wait (%p1688_p8), %s345_s22, 256  }
  0x9c   : > { %1196 = vsyncadd (%p1688_p8), %s345_s22, 4294967040  ;;  %v403_v0 = vld [vmem:[%s330_s20] sm:$0xff]  ;;  %v404_v1 = vld [vmem:[%s330_s20 + $0x8] sm:$0xff]  ;;  %vm484_vm0 = vcmask 130048   ;;  %s394_s24 = scalar_lea.vmem [#allocation11], %s1517_s14  ;;  %s859_s30 = sshll.u32 %s1219_s21, 8 }
  0x9d   : > { %v399_v2 = vld [vmem:[%s321_s16] sm:$0xff]  ;;  %v883_v3 = vpack.c.bf16 %v404_v1, %v403_v0  ;;  %v400_v5 = vld [vmem:[%s321_s16 + $0x8] sm:$0xff]  ;;  %s1557_s27 = scalar_lea.hbm %s1653_s5, %s859_s30  ;;  %s631_s26 = sshll.u32 %s394_s24, 4  ;;  %s1559_s26 = int_to_ptr.vmem [resolvable:$true] %s631_s26 }
  0x9e   : > { %v401_v4 = vmul.f32 0.17677669, %v399_v2  ;;  %v402_v6 = vmul.f32 0.17677669, %v400_v5  ;;  %v407_v7 = vld [vmem:[%s348_s25] sm:$0xff]  ;;  %v408_v9 = vld [vmem:[%s348_s25 + $0x8] sm:$0xff] }
  0x9f   : > { %884 = vmatprep.subr.bf16.mxu0 %v883_v3  ;;  %v405_v25 = vld [vmem:[%s339_s7] sm:$0xff]  ;;  %v406_v26 = vld [vmem:[%s339_s7 + $0x8] sm:$0xff]  ;;  %s598_s13 = scalar_lea.sflag [#allocation12], %s1514_s29  ;;  %s1105_s11 = scalar_lea.vmem %s1559_s26, 256 }
  0xa0   : > { %873 = vmatprep.mubr.f32.mxu0 %v401_v4  ;;  %886 = vmatpush3.bf16.xpose.msra.mxu0 %v883_v3  ;;  %v887_v27 = vpack.c.bf16 %v406_v26, %v405_v25  ;;  %p1106_p0 = scmp.ne.s32.totalorder %s1559_s26, %s1105_s11  ;;  %p1689_p1 = scmp.ne.s32.totalorder %s1674_s6, 0 }
  0xa1   : > { %s1235_s28 = smov [#allocation11]  }
  0xa2   : > { %888 = vmatprep.subr.bf16.mxu1 %v887_v27  ;;  %p1107_p6 = pnand %p1106_p0, %p1689_p1  ;;  %s1109_s10 = sshll.u32 %s1235_s28, 4  ;;  %s1110_s10 = int_to_ptr.vmem [resolvable:$false] %s1109_s10 }
  0xa3   : > { %890 = vmatpush3.bf16.msra.mxu1 %v887_v27  ;;  %s1111_s15 = scalar_lea.vmem %s1110_s10, 512  ;;  %p1112_p11 = scmp.lt.s32.totalorder %s1559_s26, %s1110_s10 }
  0xa4   : > { %p1108_p13 = pneg %p1107_p6  ;;  %p1113_p2 = scmp.lt.s32.totalorder %s1111_s15, %s1105_s11 }
  0xa6   : > { %p1114_p5 = por %p1113_p2, %p1112_p11 }
  0xa7   : > { %874 = vmatmul.mubr.f32.vlgmr.msra.gmra.mrb[0].mxu0 %v402_v6 }
  0xa8   : > { %p1115_p7 = pnand %p1114_p5, %p1108_p13 }
 0x17a   : > { %v875_v8 = vpop.f32.mrb[0].mxu0 }
 0x17b   : > { %v475_v10 = vpop.f32.mrb[1].mxu0  ;;  %v481_v12 = vadd.f32 %v875_v8, %v408_v9 }
 0x17c   : > { %v476_v11 = vadd.f32 %v475_v10, %v407_v7 }
 0x17d   : > { %v488_v14 = vsel %vm484_vm0, %v481_v12, -inf }
 0x17e   : > { %v485_v13 = vsel %vm484_vm0, %v476_v11, -inf }
 0x17f   : > { %486 = vmax.xlane.f32.xlu0 %v485_v13 }
 0x183   : > { %489 = vmax.xlane.f32.xlu0 %v488_v14 }
 0x20c   : > { %v487_v15 = vpop.xlane.xlu0 %486 }
 0x20d   : > { %v491_v16 = vsub.f32 %v476_v11, %v487_v15 }
 0x20f   : > { %v493_v17 = vmul.f32 1.442695, %v491_v16 }
 0x210   : > { %v490_v18 = vpop.xlane.xlu0 %489 }
 0x211   : > { %977 = vpow2.f32 %v493_v17  ;;  %v492_v19 = vsub.f32 %v481_v12, %v490_v18 }
 0x213   : > { %v495_v20 = vmul.f32 1.442695, %v492_v19 }
 0x215   : > { %979 = vpow2.f32 %v495_v20 }
 0x21b   : > { %v978_v21 = vpop.eup %977 }
 0x21c   : > { %v497_v22 = vsel %vm484_vm0, %v978_v21, 0.0 }
 0x21d   : > { %498 = vadd.xlane.f32.xlu1 %v497_v22 }
 0x21f   : > { %v980_v23 = vpop.eup %979 }
 0x220   : > { %v500_v24 = vsel %vm484_vm0, %v980_v23, 0.0 }
 0x221   : > { %501 = vadd.xlane.f32.xlu1 %v500_v24 }
 0x2aa   : > { %v499_v28 = vpop.xlane.xlu1 %498 }
 0x2ab   : > { %981 = vrcp.f32 %v499_v28 }
 0x2ae   : > { %v502_v29 = vpop.xlane.xlu1 %501 }
 0x2af   : > { %983 = vrcp.f32 %v502_v29 }
 0x2b5   : > { %v982_v30 = vpop.eup %981 }
 0x2b6   : > { %v504_v31 = vmul.f32 %v982_v30, %v978_v21 }
 0x2b8   : > { %880 = vmatprep.mubr.msk.f32.mxu1 %vm484_vm0, %v504_v31  ;;  %588 = vst.msk [vmem:[%s394_s24] sm:$0xff] %vm484_vm0, %v504_v31 }
 0x2b9   : > { %v984_v32 = vpop.eup %983 }
 0x2ba   : > { %v506_v33 = vmul.f32 %v984_v32, %v980_v23 }
 0x2bc   : > { %881 = vmatmul.mubr.msk.f32.vlgmr.msra.gmra.mrb[0].mxu1 %vm484_vm0, %v506_v33  ;;  %589 = vst.msk [vmem:[%s394_s24 + $0x8] sm:$0xff] %vm484_vm0, %v506_v33 }
 0x2bd   : > { %1118 = shalt.err (!%p1115_p7)
}
 0x2be   : > { %s1119_s0 = scalar_lea.hbm %s1557_s27, 256  ;;  %s1123_s16 = scalar_lea.hbm %s1653_s5, 512 }
 0x2bf   : > { %p1120_p3 = scmp.ne.s32.totalorder %s1557_s27, %s1119_s0  ;;  %p1124_p12 = scmp.lt.u32.totalorder %s1557_s27, %s1653_s5 }
 0x2c0   : > { %p1125_p4 = scmp.lt.u32.totalorder %s1123_s16, %s1119_s0  ;;  %p1127_p0 = scmp.lt.u32.totalorder %s1119_s0, %s1557_s27 }
 0x2c1   : > { %p1121_p10 = pnand %p1120_p3, %p1689_p1 }
 0x2c2   : > { %p1126_p8 = por %p1125_p4, %p1124_p12 }
 0x2c3   : > { %p1122_p9 = pneg %p1121_p10 }
 0x2c4   : > { %p1128_p6 = por %p1127_p0, %p1126_p8 }
 0x2c6   : > { %p1129_p13 = pnand %p1128_p6, %p1122_p9 }
 0x2c8   : > { %1132 = shalt.err (!%p1129_p13)
}
 0x2c9   : > { %s1236_s20 = smov 128   ;;  %s1237_s7 = smov 8  }
 0x2ca   : > { %900 = dma.vmem_to_hbm [thread:$0]  (%p1689_p1), %s1559_s26, 256, %s1557_s27, %s598_s13, %s1236_s20, %s1236_s20, %s1237_s7  }
 0x2cb   : > { %s387_s22 = scalar_lea.vmem [#allocation10], %s1517_s14  ;;  %s1596_s1 = scalar_lea.hbm %s1652_s4, %s859_s30 }
 0x2cc   : > { %s613_s25 = sshll.u32 %s387_s22, 4  ;;  %s593_s11 = scalar_lea.sflag [#allocation4], %s1514_s29  ;;  %s1589_s25 = int_to_ptr.vmem [resolvable:$true] %s613_s25 }
 0x2cd   : > { %s1133_s28 = scalar_lea.vmem %s1589_s25, 256  ;;  %s1238_s14 = smov [#allocation10]  }
 0x2ce   : > { %p1134_p11 = scmp.ne.s32.totalorder %s1589_s25, %s1133_s28  ;;  %s1137_s27 = sshll.u32 %s1238_s14, 4  ;;  %s1138_s27 = int_to_ptr.vmem [resolvable:$false] %s1137_s27 }
 0x2cf   : > { %s1139_s26 = scalar_lea.vmem %s1138_s27, 512  ;;  %p1140_p7 = scmp.lt.s32.totalorder %s1589_s25, %s1138_s27 }
 0x2d0   : > { %p1135_p2 = pnand %p1134_p11, %p1689_p1  ;;  %p1141_p3 = scmp.lt.s32.totalorder %s1139_s26, %s1133_s28 }
 0x2d2   : > { %p1136_p5 = pneg %p1135_p2  ;;  %p1142_p10 = por %p1141_p3, %p1140_p7 }
 0x2d4   : > { %p1143_p9 = pnand %p1142_p10, %p1136_p5 }
 0x38f   : > { %v882_v34 = vpop.f32.mrb[0].mxu1 }
 0x390   : > { %591 = vst [vmem:[%s387_s22 + $0x8] sm:$0xff] %v882_v34  ;;  %v579_v35 = vpop.f32.mrb[1].mxu1 }
 0x391   : > { %590 = vst [vmem:[%s387_s22] sm:$0xff] %v579_v35 }
 0x392   : > { %1146 = shalt.err (!%p1143_p9)
}
 0x393   : > { %s1147_s21 = scalar_lea.hbm %s1596_s1, 256  ;;  %s1151_s10 = scalar_lea.hbm %s1652_s4, 512 }
 0x394   : > { %p1148_p12 = scmp.ne.s32.totalorder %s1596_s1, %s1147_s21  ;;  %p1152_p0 = scmp.lt.u32.totalorder %s1596_s1, %s1652_s4 }
 0x395   : > { %p1153_p6 = scmp.lt.u32.totalorder %s1151_s10, %s1147_s21  ;;  %p1155_p11 = scmp.lt.u32.totalorder %s1147_s21, %s1596_s1 }
 0x396   : > { %p1149_p4 = pnand %p1148_p12, %p1689_p1 }
 0x397   : > { %p1154_p13 = por %p1153_p6, %p1152_p0 }
 0x398   : > { %p1150_p8 = pneg %p1149_p4 }
 0x399   : > { %p1156_p2 = por %p1155_p11, %p1154_p13 }
 0x39b   : > { %p1157_p5 = pnand %p1156_p2, %p1150_p8 }
 0x39d   : > { %1160 = shalt.err (!%p1157_p5)
}
 0x39e   : > { %899 = dma.vmem_to_hbm [thread:$0]  (%p1689_p1), %s1589_s25, 256, %s1596_s1, %s593_s11, %s1236_s20, %s1236_s20, %s1237_s7  }
 0x39f PF: > { %s1690_s8 = sld [smem:[#allocation23_spill]]  ;;  %s1691_s12 = sld [smem:[#allocation20_spill]] }
 0x3a0   : > { %s646_s16 = sand.u32 1, %s1207_s18  }
 0x3a1   : > { %s647_s9 = scalar_lea.sflag [#allocation4], %s646_s16 }
 0x3a5   : > { %p1692_p7 = scmp.ne.s32.totalorder %s1690_s8, 0  ;;  %p1693_p3 = scmp.ge.s32.totalorder %s1691_s12, 2 }
 0x3a7   : > { %p917_p10 = pnand %p1693_p3, %p1692_p7 }
 0x3a9   : > { %1198 = dma.done.wait (!%p917_p10), %s647_s9, 256  }
 0x3aa   : > { %1200 = vsyncadd (!%p917_p10), %s647_s9, 4294967040  ;;  %s656_s6 = scalar_lea.sflag [#allocation12], %s646_s16 }
 0x3ab   : > { %1202 = dma.done.wait (!%p917_p10), %s656_s6, 256  }
 0x3ac   : > { %1204 = vsyncadd (!%p917_p10), %s656_s6, 4294967040  ;;  %s31_s23 = sadd.s32 1, %s1691_s12   ;;  %s1694_s29 = sld [smem:[#allocation18_spill]] }
 0x3ad   : > { %p28_p9 = scmp.ge.s32.totalorder %s31_s23, 4   ;;  %s1695_s20 = sld [smem:[#allocation22_spill]] }
 0x3ae   : > { %s1696_s21 = sld [smem:[#allocation19_spill]]  ;;  %s1697_s22 = sld [smem:[#allocation21_spill]] }
 0x3af   : > { %s1698_s18 = smov %s1211_s19  ;;  %30 = sbr.rel (!%p28_p9) target bundleno = 15 (0xf), region = 135 }
 0x3b2   : > { %s1699_s19 = smov %s1694_s29 }
 0x3b6   :  { %661 = vsyncpa [#allocation3], 1 }
 0x3b7   :  { %663 = vsyncpa [#allocation3 + $0x1], 1 }
 0x3b8   :  { %664 = vsyncpa [#allocation6], 1 }
 0x3b9   :  { %666 = vsyncpa [#allocation6 + $0x1], 1 }
 0x3ba   :  { %667 = vsyncpa [#allocation9], 1 }
 0x3bb   :  { %669 = vsyncpa [#allocation9 + $0x1], 1 }
 0x3bc   :  { %670 = vsyncpa [#allocation4], 1 }
 0x3bd   :  { %672 = vsyncpa [#allocation4 + $0x1], 1 }
 0x3be   :  { %673 = vsyncpa [#allocation12], 1 }
 0x3bf   :  { %675 = vsyncpa [#allocation12 + $0x1], 1 }

</bundles_post_ra>
